<compile_context>
chip_gen: v7x
topology: tpu7x:2x2x1
jax: 0.10.0
libtpu: 0.0.40
codegen_flags: <defaults>
</compile_context>

<pallas_src>
import math
import jax
import jax.numpy as jnp
from jax import lax
from jax.experimental import pallas as pl
from jax.experimental.pallas import tpu as pltpu


def _gcn_kernel(src_ref, tgt_ref, x_ref, w_ref, bias_ref, o_ref):
    # Learned adjacency logits: relu(src @ tgt), softmax over dim=1 (rows).
    logits = jnp.dot(src_ref[...], tgt_ref[...],
                     preferred_element_type=jnp.float32)          # (N, N)
    logits = jnp.maximum(logits, 0.0)                             # relu
    m = jnp.max(logits, axis=1, keepdims=True)                    # row max (softmax dim=1)
    e = jnp.exp(logits - m)                                       # unnormalized softmax
    rowsum = jnp.sum(e, axis=1, keepdims=True)                    # (N, 1)
    inv = pl.reciprocal(rowsum, approx=False)                     # EUP; exact for 1e-5 tol

    w = w_ref[...]                                                # (F_out, F_in)
    bias = bias_ref[...]                                          # (1, F_out)

    # Static unroll over the (small) batch: two single-pass MXU matmuls per batch.
    B = x_ref.shape[0]
    for b in range(B):
        # Graph conv with normalization folded in: (e/rowsum) @ x == (e @ x) * inv.
        h_b = jnp.dot(e, x_ref[b], preferred_element_type=jnp.float32) * inv   # (N, F_in)
        # Linear: contract F_in of h_b against F_in of W (== h_b @ W.T).
        y_b = lax.dot_general(h_b, w, (((1,), (1,)), ((), ())),
                              preferred_element_type=jnp.float32) + bias        # (N, F_out)
        o_ref[b] = y_b.astype(o_ref.dtype)


def learned_gcn_forward(x, source_embed, target_embed, weight, bias):
    """x: (B, N, F_in); weight: (F_out, F_in) [PyTorch layout]; bias: (F_out,)."""
    B, N, F_in = x.shape
    F_out = weight.shape[0]
    emb = source_embed.shape[1]

    bias2d = bias.reshape(1, F_out)   # trivial reshape; clean 2D lane layout in VMEM

    flops = 2 * (N * emb * N + B * (N * N * F_in + N * F_in * F_out))
    bytes_accessed = 4 * (source_embed.size + target_embed.size + x.size
                          + weight.size + bias2d.size + B * N * F_out)
    cost = pl.CostEstimate(flops=flops,
                           transcendentals=N * N,          # exp on the (N, N) logits
                           bytes_accessed=bytes_accessed)

    vmem = pl.BlockSpec(memory_space=pltpu.MemorySpace.VMEM)
    return pl.pallas_call(
        _gcn_kernel,
        out_shape=jax.ShapeDtypeStruct((B, N, F_out), x.dtype),
        in_specs=[vmem, vmem, vmem, vmem, vmem],
        out_specs=vmem,
        cost_estimate=cost,
    )(source_embed, target_embed, x, weight, bias2d)


def _reference(x, source_embed, target_embed, weight, bias):
    logits = jnp.maximum(source_embed @ target_embed, 0.0)
    A = jax.nn.softmax(logits, axis=1)
    h = jnp.einsum("nm,bmf->bnf", A, x)
    return h @ weight.T + bias


if __name__ == "__main__":
    # Module hyper-parameters (small, consistent with the forward).
    node_num, in_feature, out_feature, batch = 16, 32, 32, 2

    key = jax.random.PRNGKey(0)
    k_src, k_tgt, k_w, k_b, k_x = jax.random.split(key, 5)

    # reset_parameters(): uniform(-stdv, stdv) with stdv = 1/sqrt(node_num)
    stdv = 1.0 / math.sqrt(node_num)
    source_embed = jax.random.uniform(k_src, (node_num, 10), jnp.float32, -stdv, stdv)
    target_embed = jax.random.uniform(k_tgt, (10, node_num), jnp.float32, -stdv, stdv)

    # nn.Linear default init: uniform(-k, k), k = 1/sqrt(in_feature)
    k_lin = 1.0 / math.sqrt(in_feature)
    weight = jax.random.uniform(k_w, (out_feature, in_feature), jnp.float32, -k_lin, k_lin)
    bias = jax.random.uniform(k_b, (out_feature,), jnp.float32, -k_lin, k_lin)

    x = jax.random.normal(k_x, (batch, node_num, in_feature), jnp.float32)

    out = learned_gcn_forward(x, source_embed, target_embed, weight, bias)
    out = jax.block_until_ready(out)

    ref = _reference(x, source_embed, target_embed, weight, bias)
    assert out.shape == (batch, node_num, out_feature)
    assert jnp.allclose(out, ref, atol=1e-5, rtol=1e-5), "mismatch vs reference"

    print("KERNEL_OK")
</pallas_src>

<mosaic_0001>
module attributes {stable_mosaic.version = 11 : i64} {
  func.func @_gcn_kernel(%arg0: memref<16x10xf32, #tpu.memory_space<vmem>>, %arg1: memref<10x16xf32, #tpu.memory_space<vmem>>, %arg2: memref<2x16x32xf32, #tpu.memory_space<vmem>>, %arg3: memref<32x32xf32, #tpu.memory_space<vmem>>, %arg4: memref<1x32xf32, #tpu.memory_space<vmem>>, %arg5: memref<2x16x32xf32, #tpu.memory_space<vmem>>) attributes {dimension_semantics = [], scalar_prefetch = 0 : i64, scratch_operands = 0 : i64, tpu.core_type = #tpu.core_type<tc>} {
    %c0 = arith.constant 0 : index
    %c0_0 = arith.constant 0 : index
    %0 = vector.load %arg0[%c0, %c0_0] : memref<16x10xf32, #tpu.memory_space<vmem>>, vector<16x10xf32>
    %c0_1 = arith.constant 0 : index
    %c0_2 = arith.constant 0 : index
    %1 = vector.load %arg1[%c0_1, %c0_2] : memref<10x16xf32, #tpu.memory_space<vmem>>, vector<10x16xf32>
    %cst = arith.constant dense<0.000000e+00> : vector<16x16xf32>
    %2 = tpu.matmul %0, %1, %cst {dimension_numbers = #tpu.dot_dimension_numbers<[1], [0], [0], [1], [0, 0, 1, 1], [], []>} : vector<16x10xf32>, vector<10x16xf32>, vector<16x16xf32> -> vector<16x16xf32>
    %cst_3 = arith.constant 0.000000e+00 : f32
    %3 = vector.broadcast %cst_3 : f32 to vector<16x16xf32>
    %4 = arith.maximumf %2, %3 : vector<16x16xf32>
    %cst_4 = arith.constant dense<0xFF800000> : vector<16xf32>
    %5 = vector.multi_reduction <maximumf>, %4, %cst_4 [1] : vector<16x16xf32> to vector<16xf32>
    %6 = vector.shape_cast %5 : vector<16xf32> to vector<16x1xf32>
    %7 = vector.broadcast %6 : vector<16x1xf32> to vector<16x16xf32>
    %8 = arith.subf %4, %7 : vector<16x16xf32>
    %9 = math.exp %8 : vector<16x16xf32>
    %cst_5 = arith.constant dense<0.000000e+00> : vector<16xf32>
    %10 = vector.multi_reduction <add>, %9, %cst_5 [1] : vector<16x16xf32> to vector<16xf32>
    %11 = vector.shape_cast %10 : vector<16xf32> to vector<16x1xf32>
    %12 = tpu.reciprocal %11 : vector<16x1xf32> -> vector<16x1xf32>
    %c0_6 = arith.constant 0 : index
    %c0_7 = arith.constant 0 : index
    %13 = vector.load %arg3[%c0_6, %c0_7] : memref<32x32xf32, #tpu.memory_space<vmem>>, vector<32x32xf32>
    %c0_8 = arith.constant 0 : index
    %c0_9 = arith.constant 0 : index
    %14 = vector.load %arg4[%c0_8, %c0_9] : memref<1x32xf32, #tpu.memory_space<vmem>>, vector<1x32xf32>
    %c0_10 = arith.constant 0 : index
    %c0_11 = arith.constant 0 : index
    %c0_12 = arith.constant 0 : index
    %15 = vector.load %arg2[%c0_10, %c0_11, %c0_12] : memref<2x16x32xf32, #tpu.memory_space<vmem>>, vector<1x16x32xf32>
    %16 = vector.shape_cast %15 : vector<1x16x32xf32> to vector<16x32xf32>
    %cst_13 = arith.constant dense<0.000000e+00> : vector<16x32xf32>
    %17 = tpu.matmul %9, %16, %cst_13 {dimension_numbers = #tpu.dot_dimension_numbers<[1], [0], [0], [1], [0, 0, 1, 1], [], []>} : vector<16x16xf32>, vector<16x32xf32>, vector<16x32xf32> -> vector<16x32xf32>
    %18 = vector.broadcast %12 : vector<16x1xf32> to vector<16x32xf32>
    %19 = arith.mulf %17, %18 : vector<16x32xf32>
    %cst_14 = arith.constant dense<0.000000e+00> : vector<16x32xf32>
    %20 = tpu.matmul %19, %13, %cst_14 {dimension_numbers = #tpu.dot_dimension_numbers<[1], [1], [0], [0], [0, 0, 1, 0], [], []>} : vector<16x32xf32>, vector<32x32xf32>, vector<16x32xf32> -> vector<16x32xf32>
    %21 = vector.broadcast %14 : vector<1x32xf32> to vector<16x32xf32>
    %22 = arith.addf %20, %21 : vector<16x32xf32>
    %c0_15 = arith.constant 0 : index
    %c0_16 = arith.constant 0 : index
    %c0_17 = arith.constant 0 : index
    %23 = vector.load %arg5[%c0_15, %c0_16, %c0_17] : memref<2x16x32xf32, #tpu.memory_space<vmem>>, vector<1x16x32xf32>
    %24 = vector.shape_cast %23 : vector<1x16x32xf32> to vector<16x32xf32>
    %25 = vector.shape_cast %22 : vector<16x32xf32> to vector<1x16x32xf32>
    tpu.vector_store %arg5[%c0_15, %c0_16, %c0_17], %25 {strides = array<i32>} : memref<2x16x32xf32, #tpu.memory_space<vmem>>, vector<1x16x32xf32>,
    %c1 = arith.constant 1 : index
    %c0_18 = arith.constant 0 : index
    %c0_19 = arith.constant 0 : index
    %26 = vector.load %arg2[%c1, %c0_18, %c0_19] : memref<2x16x32xf32, #tpu.memory_space<vmem>>, vector<1x16x32xf32>
    %27 = vector.shape_cast %26 : vector<1x16x32xf32> to vector<16x32xf32>
    %cst_20 = arith.constant dense<0.000000e+00> : vector<16x32xf32>
    %28 = tpu.matmul %9, %27, %cst_20 {dimension_numbers = #tpu.dot_dimension_numbers<[1], [0], [0], [1], [0, 0, 1, 1], [], []>} : vector<16x16xf32>, vector<16x32xf32>, vector<16x32xf32> -> vector<16x32xf32>
    %29 = vector.broadcast %12 : vector<16x1xf32> to vector<16x32xf32>
    %30 = arith.mulf %28, %29 : vector<16x32xf32>
    %cst_21 = arith.constant dense<0.000000e+00> : vector<16x32xf32>
    %31 = tpu.matmul %30, %13, %cst_21 {dimension_numbers = #tpu.dot_dimension_numbers<[1], [1], [0], [0], [0, 0, 1, 0], [], []>} : vector<16x32xf32>, vector<32x32xf32>, vector<16x32xf32> -> vector<16x32xf32>
    %32 = vector.broadcast %14 : vector<1x32xf32> to vector<16x32xf32>
    %33 = arith.addf %31, %32 : vector<16x32xf32>
    %c1_22 = arith.constant 1 : index
    %c0_23 = arith.constant 0 : index
    %c0_24 = arith.constant 0 : index
    %34 = vector.load %arg5[%c1_22, %c0_23, %c0_24] : memref<2x16x32xf32, #tpu.memory_space<vmem>>, vector<1x16x32xf32>
    %35 = vector.shape_cast %34 : vector<1x16x32xf32> to vector<16x32xf32>
    %36 = vector.shape_cast %33 : vector<16x32xf32> to vector<1x16x32xf32>
    tpu.vector_store %arg5[%c1_22, %c0_23, %c0_24], %36 {strides = array<i32>} : memref<2x16x32xf32, #tpu.memory_space<vmem>>, vector<1x16x32xf32>,
    return
  }
}

</mosaic_0001>

<bundles_post_ra>
// kernel: tpu_custom_call.1
= control target key start
LH: loop header
LB: loop body
LE: loop exit
PB: predicated region body
PF: predicated region fallthrough
CT: control target
= control target key end

     0   :  { %10 = vsyncpa [#allocation3], 0  ;;  %s971_s0 = inlined_call_operand.hbm [shape: f32[16,10], index: 0, kind: input, shape index: {}]   ;;  %s972_s1 = inlined_call_operand.hbm [shape: f32[10,16], index: 1, kind: input, shape index: {}]   ;;  %s973_s2 = inlined_call_operand.hbm [shape: f32[2,16,32], index: 2, kind: input, shape index: {}]   ;;  %s974_s3 = inlined_call_operand.hbm [shape: f32[32,32], index: 3, kind: input, shape index: {}]   ;;  %s975_s4 = inlined_call_operand.vmem [shape: f32[1,32], index: 4, kind: input, shape index: {}]   ;;  %s976_s5 = inlined_call_operand.hbm [shape: f32[2,16,32], index: 5, kind: output, shape index: {}]  }
   0x1   :  { %11 = vsyncpa [#allocation6], 0 }
   0x2   :  { %12 = vsyncpa [#allocation9], 0 }
   0x3   :  { %13 = vsyncpa [#allocation4], 0  ;;  %s823_s18 = smov [#allocation5]   ;;  %s824_s20 = smov [#allocation2]  }
   0x4   :  { %s31_s19 = sshll.u32 %s823_s18, 4  ;;  %s19_s21 = sshll.u32 %s824_s20, 4  ;;  %s32_s19 = int_to_ptr.vmem [resolvable:$true] %s31_s19  ;;  %s861_s21 = int_to_ptr.vmem [resolvable:$true] %s19_s21 }
   0x5   :  { %s705_s24 = scalar_lea.hbm %s972_s1, 256 }
   0x6   :  { %p706_p0 = scmp.ne.s32.totalorder %s972_s1, %s705_s24  ;;  %p709_p1 = scmp.lt.u32.totalorder %s705_s24, %s972_s1 }
   0x8   :  { %p711_p2 = pnand %p709_p1, %p706_p0 }
   0xa   :  { %714 = shalt.err (!%p711_p2)
}
   0xb   :  { %s715_s29 = scalar_lea.vmem %s32_s19, 256  ;;  %p720_p4 = scmp.lt.s32.totalorder %s32_s19, %s32_s19 }
   0xc   :  { %p716_p3 = scmp.ne.s32.totalorder %s32_s19, %s715_s29  ;;  %p721_p5 = scmp.lt.s32.totalorder %s715_s29, %s715_s29 }
   0xe   :  { %p722_p6 = por %p721_p5, %p720_p4 }
  0x10   :  { %p723_p7 = pnand %p722_p6, %p716_p3 }
  0x12   :  { %726 = shalt.err (!%p723_p7)
}
  0x13   :  { %s825_s30 = smov 128   ;;  %s826_s6 = smov 8  }
  0x14   :  { %37 = dma.hbm_to_vmem [thread:$0]  %s972_s1, 256, %s32_s19, [#allocation6], %s825_s30, %s825_s30, %s826_s6  }
  0x15   :  { %s727_s11 = scalar_lea.hbm %s971_s0, 256 }
  0x16   :  { %p728_p8 = scmp.ne.s32.totalorder %s971_s0, %s727_s11  ;;  %p731_p9 = scmp.lt.u32.totalorder %s727_s11, %s971_s0 }
  0x18   :  { %p733_p10 = pnand %p731_p9, %p728_p8 }
  0x1a   :  { %736 = shalt.err (!%p733_p10)
}
  0x1b   :  { %s737_s16 = scalar_lea.vmem %s861_s21, 256  ;;  %p742_p12 = scmp.lt.s32.totalorder %s861_s21, %s861_s21 }
  0x1c   :  { %p738_p11 = scmp.ne.s32.totalorder %s861_s21, %s737_s16  ;;  %p743_p13 = scmp.lt.s32.totalorder %s737_s16, %s737_s16 }
  0x1e   :  { %p744_p0 = por %p743_p13, %p742_p12 }
  0x20   :  { %p745_p1 = pnand %p744_p0, %p738_p11 }
  0x22   :  { %748 = shalt.err (!%p745_p1)
}
  0x23   :  { %25 = dma.hbm_to_vmem [thread:$0]  %s971_s0, 256, %s861_s21, [#allocation3], %s825_s30, %s825_s30, %s826_s6  }
  0x24   :  { %s827_s18 = smov [#allocation7]   ;;  %s828_s20 = smov [#allocation8]  }
  0x25   :  { %s43_s19 = sshll.u32 %s827_s18, 4  ;;  %s55_s22 = sshll.u32 %s828_s20, 4  ;;  %s44_s19 = int_to_ptr.vmem [resolvable:$true] %s43_s19  ;;  %s898_s22 = int_to_ptr.vmem [resolvable:$true] %s55_s22 }
  0x26   :  { %s749_s25 = scalar_lea.hbm %s973_s2, 512 }
  0x27   :  { %p750_p2 = scmp.ne.s32.totalorder %s973_s2, %s749_s25  ;;  %p753_p3 = scmp.lt.u32.totalorder %s749_s25, %s973_s2 }
  0x29   :  { %p755_p4 = pnand %p753_p3, %p750_p2 }
  0x2b   :  { %758 = shalt.err (!%p755_p4)
}
  0x2c   :  { %s759_s0 = scalar_lea.vmem %s44_s19, 512  ;;  %p764_p6 = scmp.lt.s32.totalorder %s44_s19, %s44_s19 }
  0x2d   :  { %p760_p5 = scmp.ne.s32.totalorder %s44_s19, %s759_s0  ;;  %p765_p7 = scmp.lt.s32.totalorder %s759_s0, %s759_s0 }
  0x2f   :  { %p766_p8 = por %p765_p7, %p764_p6 }
  0x31   :  { %p767_p9 = pnand %p766_p8, %p760_p5 }
  0x33   :  { %770 = shalt.err (!%p767_p9)
}
  0x34   :  { %49 = dma.hbm_to_vmem [thread:$0]  %s973_s2, 512, %s44_s19, [#allocation6], %s825_s30, %s825_s30, %s826_s6  }
  0x35   :  { %s771_s10 = scalar_lea.hbm %s974_s3, 512 }
  0x36   :  { %p772_p10 = scmp.ne.s32.totalorder %s974_s3, %s771_s10  ;;  %p775_p11 = scmp.lt.u32.totalorder %s771_s10, %s974_s3 }
  0x38   :  { %p777_p12 = pnand %p775_p11, %p772_p10 }
  0x3a   :  { %780 = shalt.err (!%p777_p12)
}
  0x3b   :  { %s781_s15 = scalar_lea.vmem %s898_s22, 512  ;;  %p786_p0 = scmp.lt.s32.totalorder %s898_s22, %s898_s22 }
  0x3c   :  { %p782_p13 = scmp.ne.s32.totalorder %s898_s22, %s781_s15  ;;  %p787_p1 = scmp.lt.s32.totalorder %s781_s15, %s781_s15 }
  0x3e   :  { %p788_p2 = por %p787_p1, %p786_p0 }
  0x40   :  { %p789_p3 = pnand %p788_p2, %p782_p13 }
  0x42   :  { %792 = shalt.err (!%p789_p3)
}
  0x43   :  { %61 = dma.hbm_to_vmem [thread:$0]  %s974_s3, 512, %s898_s22, [#allocation9], %s825_s30, %s825_s30, %s826_s6  }
  0x44   :  { %815 = dma.done.wait [#allocation3], 256  }
  0x45   :  { %816 = vsyncadd [#allocation3], 4294967040 }
  0x46   :  { %817 = dma.done.wait [#allocation6], 768  }
  0x47   :  { %818 = vsyncadd [#allocation6], 4294966528 }
  0x48   :  { %819 = dma.done.wait [#allocation9], 512  }
  0x49   :  { %820 = vsyncadd [#allocation9], 4294966784  ;;  %vm87_vm0 = vcmask 1041408   ;;  %vm80_vm1 = vcmask 80896   ;;  %vm829_vm2 = vmmov 1   ;;  %v78_v0 = vld [vmem:[#allocation5] sm:$0xff] }
  0x4a   :  { %vm652_vm3 = vmpackc.low %vm87_vm0, %vm829_vm2  ;;  %v79_v1 = vld [vmem:[#allocation5 + $0x8] sm:$0x3]  ;;  %v76_v2 = vld [vmem:[#allocation2] sm:$0xff]  ;;  %vm168_vm4 = vcmask 130048   ;;  %vm285_vm5 = vcmask 261120   ;;  %s830_s17 = smov [#allocation10]  }
  0x4b   :  { %v651_v3 = vpack.c.bf16 %v79_v1, %v78_v0  ;;  %612 = vmatprep.mubr.msk.f32.mxu0 %vm80_vm1, %v76_v2  ;;  %v77_v4 = vld [vmem:[#allocation2 + $0x8] sm:$0xff]  ;;  %v194_v11 = vld [vmem:[#allocation7] sm:$0xff]  ;;  %v382_v14 = vld [vmem:[#allocation7 + $0x10] sm:$0xff]  ;;  %s550_s18 = sshll.u32 %s830_s17, 4  ;;  %s551_s18 = int_to_ptr.vmem [resolvable:$true] %s550_s18 }
  0x4c   :  { %v195_v12 = vld [vmem:[#allocation7 + $0x8] sm:$0xff]  ;;  %v383_v15 = vld [vmem:[#allocation7 + $0x18] sm:$0xff]  ;;  %v189_v27 = vld [vmem:[#allocation8] sm:$0xff]  ;;  %p798_p5 = scmp.lt.s32.totalorder %s551_s18, %s551_s18 }
  0x4d   :  { %653 = vmatprep.subr.msk.bf16.mxu0 %vm652_vm3, %v651_v3  ;;  %v657_v13 = vpack.c.bf16 %v195_v12, %v194_v11  ;;  %v673_v16 = vpack.c.bf16 %v383_v15, %v382_v14  ;;  %v190_v28 = vld [vmem:[#allocation8 + $0x8] sm:$0xff]  ;;  %v191_v29 = vld [vmem:[#allocation8 + $0x10] sm:$0xff]  ;;  %vm662_vm6 = vmpackc.low %vm285_vm5, %vm285_vm5 }
  0x4e   :  { %656 = vmatpush3.bf16.msk.msra.mxu0 %vm652_vm3, %v651_v3  ;;  %v661_v30 = vpack.c.bf16 %v190_v28, %v189_v27  ;;  %v192_v31 = vld [vmem:[#allocation8 + $0x18] sm:$0xff]  ;;  %v569_v45 = vld [vmem:[%s975_s4] ss:$0 sm:$0xff]  ;;  %s793_s4 = scalar_lea.vmem %s551_s18, 512 }
  0x4f   :  { %658 = vmatprep.subr.bf16.mxu1 %v657_v13  ;;  %v667_v32 = vpack.c.bf16 %v192_v31, %v191_v29  ;;  %p794_p4 = scmp.ne.s32.totalorder %s551_s18, %s793_s4  ;;  %p799_p6 = scmp.lt.s32.totalorder %s793_s4, %s793_s4 }
  0x50   :  { %660 = vmatpush3.bf16.msra.mxu1 %v657_v13  ;;  %663 = vmatprep.subr.msk.bf16.mxu0 %vm662_vm6, %v661_v30 }
  0x51   :  { %613 = vmatmul.mubr.msk.f32.vlgmr.msra.gmra.mrb[0].mxu0 %vm80_vm1, %v77_v4  ;;  %674 = vmatprep.subr.bf16.mxu1 %v673_v16  ;;  %p800_p7 = por %p799_p6, %p798_p5 }
  0x53   :  { %p801_p8 = pnand %p800_p7, %p794_p4 }
  0x57   :  { %666 = vmatpush3.bf16.xpose.msk.msra.mxu0 %vm662_vm6, %v661_v30 }
  0x58   :  { %669 = vmatprep.subr.msk.bf16.mxu0 %vm662_vm6, %v667_v32 }
  0x5f   :  { %672 = vmatpush3.bf16.xpose.msk.msra.mxu0 %vm662_vm6, %v667_v32 }
 0x124   :  { %v614_v5 = vpop.f32.mrb[0].mxu0 }
 0x125   :  { %v157_v6 = vpop.f32.mrb[1].mxu0  ;;  %v167_v8 = vmax.f32 %v614_v5, 0.0 }
 0x126   :  { %v166_v7 = vmax.f32 %v157_v6, 0.0 }
 0x127   :  { %v172_v10 = vsel %vm168_vm4, %v167_v8, -inf }
 0x128   :  { %v169_v9 = vsel %vm168_vm4, %v166_v7, -inf }
 0x129   :  { %170 = vmax.xlane.f32.xlu0 %v169_v9 }
 0x12d   :  { %173 = vmax.xlane.f32.xlu0 %v172_v10 }
 0x1b6   :  { %v171_v17 = vpop.xlane.xlu0 %170 }
 0x1b7   :  { %v175_v18 = vsub.f32 %v166_v7, %v171_v17 }
 0x1b9   :  { %v177_v19 = vmul.f32 1.442695, %v175_v18 }
 0x1ba   :  { %v174_v20 = vpop.xlane.xlu0 %173 }
 0x1bb   :  { %697 = vpow2.f32 %v177_v19  ;;  %v176_v21 = vsub.f32 %v167_v8, %v174_v20 }
 0x1bd   :  { %v179_v22 = vmul.f32 1.442695, %v176_v21 }
 0x1bf   :  { %699 = vpow2.f32 %v179_v22 }
 0x1c5   :  { %v698_v23 = vpop.eup %697 }
 0x1c6   :  { %619 = vmatprep.mubr.msk.f32.mxu1 %vm168_vm4, %v698_v23  ;;  %v181_v24 = vsel %vm168_vm4, %v698_v23, 0.0 }
 0x1c7   :  { %182 = vadd.xlane.f32.xlu1 %v181_v24 }
 0x1c9   :  { %v700_v25 = vpop.eup %699 }
 0x1ca   :  { %620 = vmatmul.mubr.msk.f32.vlgmr.msra.gmra.mrb[0].mxu1 %vm168_vm4, %v700_v25  ;;  %v184_v26 = vsel %vm168_vm4, %v700_v25, 0.0 }
 0x1cb   :  { %676 = vmatpush3.bf16.msra.mxu1 %v673_v16  ;;  %637 = vmatprep.mubr.msk.f32.mxu1 %vm168_vm4, %v698_v23 }
 0x1cc   :  { %185 = vadd.xlane.f32.xlu1 %v184_v26  ;;  %679 = vmatprep.subr.msk.bf16.mxu1 %vm662_vm6, %v661_v30 }
 0x1ce   :  { %638 = vmatmul.mubr.msk.f32.vlgmr.msra.gmra.mrb[2].mxu1 %vm168_vm4, %v700_v25 }
 0x1d4   :  { %682 = vmatpush3.bf16.xpose.msk.msra.mxu1 %vm662_vm6, %v661_v30 }
 0x1d5   :  { %685 = vmatprep.subr.msk.bf16.mxu1 %vm662_vm6, %v667_v32 }
 0x1dc   :  { %688 = vmatpush3.bf16.xpose.msk.msra.mxu1 %vm662_vm6, %v667_v32 }
 0x254   :  { %v183_v33 = vpop.xlane.xlu1 %182 }
 0x255   :  { %701 = vrcp.f32 %v183_v33 }
 0x259   :  { %v186_v34 = vpop.xlane.xlu1 %185 }
 0x25a   :  { %703 = vrcp.f32 %v186_v34 }
 0x25f   :  { %v702_v36 = vpop.eup %701 }
 0x264   :  { %v704_v38 = vpop.eup %703 }
 0x29d   :  { %v621_v35 = vpop.f32.mrb[0].mxu1 }
 0x29e   :  { %v268_v37 = vpop.f32.mrb[1].mxu1  ;;  %v278_v40 = vmul.f32 %v704_v38, %v621_v35 }
 0x29f   :  { %v277_v39 = vmul.f32 %v702_v36, %v268_v37 }
 0x2a1   :  { %630 = vmatprep.mubr.msk.f32.mxu0 %vm285_vm5, %v277_v39  ;;  %v639_v41 = vpop.f32.mrb[2].mxu1 }
 0x2a2   :  { %631 = vmatmul.mubr.msk.f32.vlgmr.msra.gmra.mrb[2].mxu0 %vm285_vm5, %v278_v40  ;;  %v450_v42 = vpop.f32.mrb[3].mxu1  ;;  %v460_v44 = vmul.f32 %v704_v38, %v639_v41 }
 0x2a3   :  { %v459_v43 = vmul.f32 %v702_v36, %v450_v42 }
 0x2a5   :  { %648 = vmatprep.mubr.msk.f32.mxu1 %vm285_vm5, %v459_v43 }
 0x2a6   :  { %649 = vmatmul.mubr.msk.f32.vlgmr.msra.gmra.mrb[4].mxu1 %vm285_vm5, %v460_v44 }
 0x375   :  { %v632_v46 = vpop.f32.mrb[2].mxu0 }
 0x376   :  { %v376_v47 = vadd.f32 %v632_v46, %v569_v45  ;;  %v370_v48 = vpop.f32.mrb[3].mxu0 }
 0x377   :  { %v371_v49 = vadd.f32 %v569_v45, %v370_v48 }
 0x378   :  { %380 = vst.msk [vmem:[#allocation10 + $0x8] sm:$0xff] %vm285_vm5, %v376_v47 }
 0x379   :  { %379 = vst.msk [vmem:[#allocation10] sm:$0xff] %vm285_vm5, %v371_v49  ;;  %v650_v50 = vpop.f32.mrb[4].mxu1 }
 0x37a   :  { %v539_v51 = vadd.f32 %v650_v50, %v569_v45  ;;  %v533_v52 = vpop.f32.mrb[5].mxu1 }
 0x37b   :  { %v534_v53 = vadd.f32 %v569_v45, %v533_v52 }
 0x37c   :  { %544 = vst.msk [vmem:[#allocation10 + $0x18] sm:$0xff] %vm285_vm5, %v539_v51 }
 0x37d   :  { %543 = vst.msk [vmem:[#allocation10 + $0x10] sm:$0xff] %vm285_vm5, %v534_v53 }
 0x37e   :  { %804 = shalt.err (!%p801_p8)
}
 0x37f   :  { %s805_s22 = scalar_lea.hbm %s976_s5, 512 }
 0x380   :  { %p806_p9 = scmp.ne.s32.totalorder %s976_s5, %s805_s22  ;;  %p809_p10 = scmp.lt.u32.totalorder %s805_s22, %s976_s5 }
 0x382   :  { %p811_p11 = pnand %p809_p10, %p806_p9 }
 0x384   :  { %814 = shalt.err (!%p811_p11)
}
 0x385   :  { %556 = dma.vmem_to_hbm [thread:$0]  %s551_s18, 512, %s976_s5, [#allocation4], %s825_s30, %s825_s30, %s826_s6  }
 0x386   :  { %821 = dma.done.wait [#allocation4], 512  }
 0x387   :  { %822 = vsyncadd [#allocation4], 4294966784 }
 0x388   :  { %560 = vsyncpa [#allocation3], 1 }
 0x389   :  { %561 = vsyncpa [#allocation6], 1 }
 0x38a   :  { %562 = vsyncpa [#allocation9], 1 }
 0x38b   :  { %563 = vsyncpa [#allocation4], 1 }

</bundles_post_ra>
